<compile_context>
chip_gen: v7x
topology: tpu7x:2x2x1
jax: 0.10.0
libtpu: 0.0.40
codegen_flags: <defaults>
</compile_context>

<pallas_src>
import functools

import jax
import jax.numpy as jnp
from jax.experimental import pallas as pl
from jax.experimental.pallas import tpu as pltpu


# ----------------------------------------------------------------------------
# Pallas kernel: one (batch, head-block) step of NodeTaskHead.
# ----------------------------------------------------------------------------
def _node_task_kernel(x_ref, bias_ref, dpos_ref, w_ref, b_ref, bf_ref,
                      out_ref, f_acc, *, head_dim, heads_per_block):
    hd = head_dim
    Hb = heads_per_block
    seg = 2 * hd + 3                     # per-head columns: [q(hd) | k(hd) | u(3)]
    hb = pl.program_id(1)
    n = x_ref.shape[1]

    @pl.when(hb == 0)
    def _init():
        f_acc[...] = jnp.zeros_like(f_acc)

    # Fused projection for this head block: [n, D] @ [D, Hb*seg].
    # Weights are VMEM-resident for the whole grid; w_ref[hb] slices the
    # block's slab out of VMEM (leading-axis dynamic index, no extra DMA).
    qkv = jnp.dot(x_ref[0], w_ref[hb],
                  preferred_element_type=jnp.float32) + b_ref[hb]
    qkv = qkv.astype(jnp.bfloat16)                          # [n, Hb*seg]

    dpos = dpos_ref[0]                                      # [3, n, n] bf16

    for j in range(Hb):                                     # static unroll
        base = j * seg
        q = qkv[:, base:base + hd]                          # 1/sqrt(hd) pre-folded
        k = qkv[:, base + hd:base + 2 * hd]
        u = qkv[:, base + 2 * hd:base + seg]                # v_h @ Wf_h, [n, 3]

        # scores + bias + numerically-stable softmax numerator.
        s = jax.lax.dot_general(q, k, (((1,), (1,)), ((), ())),
                                preferred_element_type=jnp.float32)   # [n, n]
        s = s + bias_ref[0, j].astype(jnp.float32)
        s = s - jnp.max(s, axis=-1, keepdims=True)
        p = jnp.exp(s.astype(jnp.bfloat16))                 # bf16 EUP exp
        inv = pl.reciprocal(
            jnp.sum(p.astype(jnp.float32), axis=-1, keepdims=True),
            approx=True)                                    # [n, 1] f32

        # Rotational attention: 3 spatial axes stacked into one matmul; the
        # softmax denominator is applied to the tiny [3n, 3] result in f32.
        rot3 = (p[None, :, :] * dpos).reshape(3 * n, n)     # bf16 [3n, n]
        xa = jnp.dot(rot3, u, preferred_element_type=jnp.float32)     # [3n, 3]
        inv3 = jnp.concatenate([inv, inv, inv], axis=0)     # [3n, 1]
        f_acc[...] += xa * inv3

    # Finalize at the last head block: pick the per-axis component, add bias.
    @pl.when(hb == pl.num_programs(1) - 1)
    def _finalize():
        fr = f_acc[...].reshape(3, n, 3)                    # [axis, node, col]
        sel = (jax.lax.broadcasted_iota(jnp.int32, (3, 1, 3), 0) ==
               jax.lax.broadcasted_iota(jnp.int32, (3, 1, 3), 2)
               ).astype(jnp.float32)
        force = jnp.sum(fr * sel, axis=-1)                  # [3, n] (lane-dense)
        out_ref[0] = force + bf_ref[...]                    # bf: [3, 1]


# ----------------------------------------------------------------------------
# Wrapper: NodeTaskHead.
# ----------------------------------------------------------------------------
def _pick_heads_per_block(H, hd, n):
    """Largest divisor of H with a modest per-step bias block, preferring
    Hb*(2*hd+3) >= 256 (full MXU N tiles on v6e/v7x)."""
    seg = 2 * hd + 3
    best = 1
    for d in range(1, H + 1):
        if H % d:
            continue
        if d > 1 and d * n * n * 2 > (2 << 20):   # bias block <= 2 MiB (bf16)
            break
        best = d
        if d * seg >= 256:
            break
    return best


def node_task_head(x_nodes, attn_bias, delta_pos, params, num_heads):
    """x_nodes: [bsz, n, D]; attn_bias: [bsz, H, n, n]; delta_pos: [bsz, n, n, 3]."""
    bsz, n, D = x_nodes.shape
    H = num_heads
    assert D % H == 0
    hd = D // H
    Hb = _pick_heads_per_block(H, hd, n)
    n_blocks = H // Hb
    seg = 2 * hd + 3
    scaling = float(hd) ** -0.5

    # bf16 inputs (halves HBM traffic, feeds the MXU at bf16 peak); f32 accum
    # inside the kernel.  No node-dim padding: blocks are full-extent on n, so
    # the big attn_bias tensor is never rewritten in HBM just to pad it.
    xb = x_nodes.astype(jnp.bfloat16)
    bias = attn_bias.astype(jnp.bfloat16)
    dpos = jnp.transpose(delta_pos, (0, 3, 1, 2)).astype(jnp.bfloat16)  # [bsz,3,n,n]

    # ---- weight packing (one-time, wrapper-side) ----------------------------
    def per_head_w(w):                       # [D, D] -> [H, D, hd]
        return jnp.transpose(w.reshape(D, H, hd), (1, 0, 2))

    def per_head_b(b):                       # [1, D] -> [H, 1, hd]
        return jnp.transpose(b.reshape(1, H, hd), (1, 0, 2))

    wf_h = params["wf"].reshape(H, hd, 3)                               # per-head force proj
    wq_h = per_head_w(params["wq"]) * scaling                           # fold 1/sqrt(hd)
    wk_h = per_head_w(params["wk"])
    wu_h = jnp.einsum("hdk,hkc->hdc", per_head_w(params["wv"]), wf_h)   # fold Wf into Wv
    bq_h = per_head_b(params["bq"]) * scaling
    bk_h = per_head_b(params["bk"])
    bu_h = jnp.einsum("hok,hkc->hoc", per_head_b(params["bv"]), wf_h)

    w_all = jnp.concatenate([wq_h, wk_h, wu_h], axis=-1)                # [H, D, seg]
    w_all = (w_all.reshape(n_blocks, Hb, D, seg).transpose(0, 2, 1, 3)
             .reshape(n_blocks, D, Hb * seg).astype(jnp.bfloat16))
    b_all = jnp.concatenate([bq_h, bk_h, bu_h], axis=-1)                # [H, 1, seg]
    b_all = (b_all.reshape(n_blocks, Hb, 1, seg).transpose(0, 2, 1, 3)
             .reshape(n_blocks, 1, Hb * seg).astype(jnp.float32))
    bf2 = params["bf"].reshape(3, 1).astype(jnp.float32)

    kernel = functools.partial(_node_task_kernel, head_dim=hd,
                               heads_per_block=Hb)

    flops = (2 * bsz * n * D * H * seg            # fused q/k/u projection
             + 2 * bsz * H * n * n * hd           # q k^T
             + 2 * bsz * H * 3 * n * n * 3)       # rotational contraction
    bytes_accessed = int(xb.size * 2 + bias.size * 2 + dpos.size * 2
                         + w_all.size * 2 + b_all.size * 4 + bsz * 3 * n * 4)

    out = pl.pallas_call(
        kernel,
        out_shape=jax.ShapeDtypeStruct((bsz, 3, n), jnp.float32),
        grid=(bsz, n_blocks),
        in_specs=[
            pl.BlockSpec((1, n, D), lambda b, h: (b, 0, 0)),                 # x
            pl.BlockSpec((1, Hb, n, n), lambda b, h: (b, h, 0, 0)),          # attn bias
            pl.BlockSpec((1, 3, n, n), lambda b, h: (b, 0, 0, 0)),           # delta_pos
            pl.BlockSpec((n_blocks, D, Hb * seg), lambda b, h: (0, 0, 0)),   # W (resident)
            pl.BlockSpec((n_blocks, 1, Hb * seg), lambda b, h: (0, 0, 0)),   # b (resident)
            pl.BlockSpec((3, 1), lambda b, h: (0, 0)),                       # force bias
        ],
        out_specs=pl.BlockSpec((1, 3, n), lambda b, h: (b, 0, 0)),
        scratch_shapes=[pltpu.VMEM((3 * n, 3), jnp.float32)],                # force acc
        compiler_params=pltpu.CompilerParams(
            dimension_semantics=("parallel", "arbitrary")),
        cost_estimate=pl.CostEstimate(flops=int(flops),
                                      transcendentals=int(bsz * H * n * n),
                                      bytes_accessed=bytes_accessed),
    )(xb, bias, dpos, w_all, b_all, bf2)

    # (bsz, 3, n) lane-dense -> (bsz, n, 3) as the PyTorch module returns.
    return jnp.transpose(out, (0, 2, 1))


# ----------------------------------------------------------------------------
# NodeDecoder.forward (args.ft = False, last_state_only = True)
# ----------------------------------------------------------------------------
def node_decoder_forward(x, attn_bias, delta_pos, inner_states, params,
                         num_heads, ft=False, last_state_only=True,
                         pbc_expand_batched=None):
    # TODO(synk): pbc_expand_batched (periodic-boundary expanded cells) not implemented.
    sentence_rep = x[0, :, :]
    node_output = None
    if delta_pos is not None and not ft:
        x_nodes = jnp.transpose(x[1:, :, :], (1, 0, 2))    # [bsz, n, D]
        bias = attn_bias[:, -1, :, 1:, 1:]                 # [bsz, H, n, n]
        node_output = node_task_head(x_nodes, bias, delta_pos, params, num_heads)
    if last_state_only:
        inner_states = [x]
        return inner_states, node_output, sentence_rep
    return jnp.stack(inner_states), node_output, sentence_rep


# ----------------------------------------------------------------------------
# Pure-JAX f32 reference of NodeTaskHead (for the correctness check).
# ----------------------------------------------------------------------------
def _ref_node_task(x_nodes, bias, delta_pos, params, H):
    bsz, n, D = x_nodes.shape
    hd = D // H
    q = (x_nodes @ params["wq"] + params["bq"]).reshape(bsz, n, H, hd).transpose(0, 2, 1, 3)
    k = (x_nodes @ params["wk"] + params["bk"]).reshape(bsz, n, H, hd).transpose(0, 2, 1, 3)
    v = (x_nodes @ params["wv"] + params["bv"]).reshape(bsz, n, H, hd).transpose(0, 2, 1, 3)
    q = q * (hd ** -0.5)
    attn = q @ jnp.swapaxes(k, -1, -2) + bias              # [bsz, H, n, n]
    attn = jax.nn.softmax(attn, axis=-1)
    rot = attn[..., None] * delta_pos[:, None]             # [bsz, H, n, n, 3]
    rot = rot.transpose(0, 1, 4, 2, 3)                     # [bsz, H, 3, n, n]
    xo = rot @ v[:, :, None]                               # [bsz, H, 3, n, hd]
    xo = xo.transpose(0, 3, 2, 1, 4).reshape(bsz, n, 3, D)
    f = jnp.einsum("bnad,da->bna", xo, params["wf"]) + params["bf"][0]
    return f


def init_params(key, D):
    ks = jax.random.split(key, 8)
    s = 0.02
    return {
        "wq": s * jax.random.normal(ks[0], (D, D), jnp.float32),
        "bq": s * jax.random.normal(ks[1], (1, D), jnp.float32),
        "wk": s * jax.random.normal(ks[2], (D, D), jnp.float32),
        "bk": s * jax.random.normal(ks[3], (1, D), jnp.float32),
        "wv": s * jax.random.normal(ks[4], (D, D), jnp.float32),
        "bv": s * jax.random.normal(ks[5], (1, D), jnp.float32),
        "wf": s * jax.random.normal(ks[6], (D, 3), jnp.float32),  # [force_proj1|2|3].weight.T
        "bf": s * jax.random.normal(ks[7], (1, 3), jnp.float32),
    }


if __name__ == "__main__":
    D, H = 32, 4          # embedding_dim, num_attention_heads
    bsz, n_node = 2, 8
    seq = n_node + 1      # leading graph/CLS token
    L = 2                 # size of the axis sliced by attn_bias[:, -1]

    key = jax.random.PRNGKey(0)
    k_x, k_b, k_d, k_p = jax.random.split(key, 4)
    x = jax.random.normal(k_x, (seq, bsz, D), jnp.float32)
    attn_bias = jax.random.normal(k_b, (bsz, L, H, seq, seq), jnp.float32)
    delta_pos = jax.random.normal(k_d, (bsz, n_node, n_node, 3), jnp.float32)
    params = init_params(k_p, D)

    inner_states, node_output, sentence_rep = node_decoder_forward(
        x, attn_bias, delta_pos, inner_states=[], params=params, num_heads=H)
    node_output = jax.block_until_ready(node_output)
    sentence_rep = jax.block_until_ready(sentence_rep)

    # Correctness check against the f32 pure-JAX reference (kernel uses bf16
    # MXU operands, bf16 exp + approx reciprocal, so compare with a relative
    # criterion on the output scale).
    x_nodes = jnp.transpose(x[1:, :, :], (1, 0, 2))
    bias = attn_bias[:, -1, :, 1:, 1:]
    ref = _ref_node_task(x_nodes, bias, delta_pos, params, H)

    assert node_output.shape == (bsz, n_node, 3)
    assert sentence_rep.shape == (bsz, D)
    assert len(inner_states) == 1 and inner_states[0].shape == x.shape
    err = float(jnp.max(jnp.abs(node_output - ref)))
    scale = float(jnp.max(jnp.abs(ref)))
    assert err <= 0.05 * scale + 1e-6, (err, scale)

    print("KERNEL_OK")
</pallas_src>

<mosaic_0001>
module attributes {stable_mosaic.version = 11 : i64} {
  func.func @_node_task_kernel(%arg0: i32, %arg1: i32, %arg2: memref<1x8x32xbf16, #tpu.memory_space<vmem>>, %arg3: memref<1x4x8x8xbf16, #tpu.memory_space<vmem>>, %arg4: memref<1x3x8x8xbf16, #tpu.memory_space<vmem>>, %arg5: memref<1x32x76xbf16, #tpu.memory_space<vmem>>, %arg6: memref<1x1x76xf32, #tpu.memory_space<vmem>>, %arg7: memref<3x1xf32, #tpu.memory_space<vmem>>, %arg8: memref<1x3x8xf32, #tpu.memory_space<vmem>>, %arg9: memref<24x3xf32, #tpu.memory_space<vmem>>) attributes {dimension_semantics = [#tpu.dimension_semantics<parallel>, #tpu.dimension_semantics<arbitrary>], iteration_bounds = array<i64: 2, 1>, scalar_prefetch = 0 : i64, scratch_operands = 1 : i64, tpu.core_type = #tpu.core_type<tc>, window_params = [{transform_indices = @transform_0, window_bounds = array<i64: 1, 8, 32>}, {transform_indices = @transform_1, window_bounds = array<i64: 1, 4, 8, 8>}, {transform_indices = @transform_2, window_bounds = array<i64: 1, 3, 8, 8>}, {pipeline_mode = #tpu.pipeline_mode<synchronous>, transform_indices = @transform_3, window_bounds = array<i64: 1, 32, 76>}, {pipeline_mode = #tpu.pipeline_mode<synchronous>, transform_indices = @transform_4, window_bounds = array<i64: 1, 1, 76>}, {pipeline_mode = #tpu.pipeline_mode<synchronous>, transform_indices = @transform_5, window_bounds = array<i64: 3, 1>}, {transform_indices = @transform_6, window_bounds = array<i64: 1, 3, 8>}]} {
    %c0_i32 = arith.constant 0 : i32
    %0 = arith.cmpi eq, %arg1, %c0_i32 : i32
    %1 = arith.extui %0 : i1 to i32
    %c0_i32_0 = arith.constant 0 : i32
    %2 = arith.cmpi ne, %1, %c0_i32_0 : i32
    scf.if %2 {
      %cst_58 = arith.constant 0.000000e+00 : f32
      %136 = vector.broadcast %cst_58 : f32 to vector<24x3xf32>
      %c0_59 = arith.constant 0 : index
      %c0_60 = arith.constant 0 : index
      %137 = vector.load %arg9[%c0_59, %c0_60] : memref<24x3xf32, #tpu.memory_space<vmem>>, vector<24x3xf32>
      tpu.vector_store %arg9[%c0_59, %c0_60], %136 {strides = array<i32>} : memref<24x3xf32, #tpu.memory_space<vmem>>, vector<24x3xf32>,
    } else {
    }
    %c0 = arith.constant 0 : index
    %c0_1 = arith.constant 0 : index
    %c0_2 = arith.constant 0 : index
    %3 = vector.load %arg2[%c0, %c0_1, %c0_2] : memref<1x8x32xbf16, #tpu.memory_space<vmem>>, vector<1x8x32xbf16>
    %4 = vector.shape_cast %3 : vector<1x8x32xbf16> to vector<8x32xbf16>
    %5 = arith.index_cast %arg1 : i32 to index
    %c0_3 = arith.constant 0 : index
    %c0_4 = arith.constant 0 : index
    %6 = vector.load %arg5[%5, %c0_3, %c0_4] : memref<1x32x76xbf16, #tpu.memory_space<vmem>>, vector<1x32x76xbf16>
    %7 = vector.shape_cast %6 : vector<1x32x76xbf16> to vector<32x76xbf16>
    %cst = arith.constant dense<0.000000e+00> : vector<8x76xf32>
    %8 = tpu.matmul %4, %7, %cst {dimension_numbers = #tpu.dot_dimension_numbers<[1], [0], [0], [1], [0, 0, 1, 1], [], []>} : vector<8x32xbf16>, vector<32x76xbf16>, vector<8x76xf32> -> vector<8x76xf32>
    %9 = arith.index_cast %arg1 : i32 to index
    %c0_5 = arith.constant 0 : index
    %c0_6 = arith.constant 0 : index
    %10 = vector.load %arg6[%9, %c0_5, %c0_6] : memref<1x1x76xf32, #tpu.memory_space<vmem>>, vector<1x1x76xf32>
    %11 = vector.shape_cast %10 : vector<1x1x76xf32> to vector<1x76xf32>
    %12 = vector.broadcast %11 : vector<1x76xf32> to vector<8x76xf32>
    %13 = arith.addf %8, %12 : vector<8x76xf32>
    %14 = arith.truncf %13 : vector<8x76xf32> to vector<8x76xbf16>
    %c0_7 = arith.constant 0 : index
    %c0_8 = arith.constant 0 : index
    %c0_9 = arith.constant 0 : index
    %c0_10 = arith.constant 0 : index
    %15 = vector.load %arg4[%c0_7, %c0_8, %c0_9, %c0_10] : memref<1x3x8x8xbf16, #tpu.memory_space<vmem>>, vector<1x3x8x8xbf16>
    %16 = vector.shape_cast %15 : vector<1x3x8x8xbf16> to vector<3x8x8xbf16>
    %17 = vector.extract_strided_slice %14 {offsets = [0, 0], sizes = [8, 8], strides = [1, 1]} : vector<8x76xbf16> to vector<8x8xbf16>
    %18 = vector.extract_strided_slice %14 {offsets = [0, 8], sizes = [8, 8], strides = [1, 1]} : vector<8x76xbf16> to vector<8x8xbf16>
    %19 = vector.extract_strided_slice %14 {offsets = [0, 16], sizes = [8, 3], strides = [1, 1]} : vector<8x76xbf16> to vector<8x3xbf16>
    %cst_11 = arith.constant dense<0.000000e+00> : vector<8x8xf32>
    %20 = tpu.matmul %17, %18, %cst_11 {dimension_numbers = #tpu.dot_dimension_numbers<[1], [1], [0], [0], [0, 0, 1, 0], [], []>} : vector<8x8xbf16>, vector<8x8xbf16>, vector<8x8xf32> -> vector<8x8xf32>
    %c0_12 = arith.constant 0 : index
    %c0_13 = arith.constant 0 : index
    %c0_14 = arith.constant 0 : index
    %c0_15 = arith.constant 0 : index
    %21 = vector.load %arg3[%c0_12, %c0_13, %c0_14, %c0_15] : memref<1x4x8x8xbf16, #tpu.memory_space<vmem>>, vector<1x1x8x8xbf16>
    %22 = vector.shape_cast %21 : vector<1x1x8x8xbf16> to vector<8x8xbf16>
    %23 = arith.extf %22 : vector<8x8xbf16> to vector<8x8xf32>
    %24 = arith.addf %20, %23 : vector<8x8xf32>
    %cst_16 = arith.constant dense<0xFF800000> : vector<8xf32>
    %25 = vector.multi_reduction <maximumf>, %24, %cst_16 [1] : vector<8x8xf32> to vector<8xf32>
    %26 = vector.shape_cast %25 : vector<8xf32> to vector<8x1xf32>
    %27 = vector.broadcast %26 : vector<8x1xf32> to vector<8x8xf32>
    %28 = arith.subf %24, %27 : vector<8x8xf32>
    %29 = arith.truncf %28 : vector<8x8xf32> to vector<8x8xbf16>
    %30 = math.exp %29 : vector<8x8xbf16>
    %31 = arith.extf %30 : vector<8x8xbf16> to vector<8x8xf32>
    %cst_17 = arith.constant dense<0.000000e+00> : vector<8xf32>
    %32 = vector.multi_reduction <add>, %31, %cst_17 [1] : vector<8x8xf32> to vector<8xf32>
    %33 = vector.shape_cast %32 : vector<8xf32> to vector<8x1xf32>
    %34 = tpu.reciprocal %33 {approx = true} : vector<8x1xf32> -> vector<8x1xf32>
    %35 = vector.shape_cast %30 : vector<8x8xbf16> to vector<1x8x8xbf16>
    %36 = vector.broadcast %35 : vector<1x8x8xbf16> to vector<3x8x8xbf16>
    %37 = arith.mulf %36, %16 : vector<3x8x8xbf16>
    %38 = vector.shape_cast %37 : vector<3x8x8xbf16> to vector<24x8xbf16>
    %cst_18 = arith.constant dense<0.000000e+00> : vector<24x3xf32>
    %39 = tpu.matmul %38, %19, %cst_18 {dimension_numbers = #tpu.dot_dimension_numbers<[1], [0], [0], [1], [0, 0, 1, 1], [], []>} : vector<24x8xbf16>, vector<8x3xbf16>, vector<24x3xf32> -> vector<24x3xf32>
    %40 = tpu.concatenate %34, %34, %34 in 0 : vector<8x1xf32>, vector<8x1xf32>, vector<8x1xf32> -> vector<24x1xf32>
    %c0_19 = arith.constant 0 : index
    %c0_20 = arith.constant 0 : index
    %41 = vector.load %arg9[%c0_19, %c0_20] : memref<24x3xf32, #tpu.memory_space<vmem>>, vector<24x3xf32>
    %42 = vector.broadcast %40 : vector<24x1xf32> to vector<24x3xf32>
    %43 = arith.mulf %39, %42 : vector<24x3xf32>
    %44 = arith.addf %41, %43 : vector<24x3xf32>
    %c0_21 = arith.constant 0 : index
    %c0_22 = arith.constant 0 : index
    %45 = vector.load %arg9[%c0_21, %c0_22] : memref<24x3xf32, #tpu.memory_space<vmem>>, vector<24x3xf32>
    tpu.vector_store %arg9[%c0_21, %c0_22], %44 {strides = array<i32>} : memref<24x3xf32, #tpu.memory_space<vmem>>, vector<24x3xf32>,
    %46 = vector.extract_strided_slice %14 {offsets = [0, 19], sizes = [8, 8], strides = [1, 1]} : vector<8x76xbf16> to vector<8x8xbf16>
    %47 = vector.extract_strided_slice %14 {offsets = [0, 27], sizes = [8, 8], strides = [1, 1]} : vector<8x76xbf16> to vector<8x8xbf16>
    %48 = vector.extract_strided_slice %14 {offsets = [0, 35], sizes = [8, 3], strides = [1, 1]} : vector<8x76xbf16> to vector<8x3xbf16>
    %cst_23 = arith.constant dense<0.000000e+00> : vector<8x8xf32>
    %49 = tpu.matmul %46, %47, %cst_23 {dimension_numbers = #tpu.dot_dimension_numbers<[1], [1], [0], [0], [0, 0, 1, 0], [], []>} : vector<8x8xbf16>, vector<8x8xbf16>, vector<8x8xf32> -> vector<8x8xf32>
    %c0_24 = arith.constant 0 : index
    %c1 = arith.constant 1 : index
    %c0_25 = arith.constant 0 : index
    %c0_26 = arith.constant 0 : index
    %50 = vector.load %arg3[%c0_24, %c1, %c0_25, %c0_26] : memref<1x4x8x8xbf16, #tpu.memory_space<vmem>>, vector<1x1x8x8xbf16>
    %51 = vector.shape_cast %50 : vector<1x1x8x8xbf16> to vector<8x8xbf16>
    %52 = arith.extf %51 : vector<8x8xbf16> to vector<8x8xf32>
    %53 = arith.addf %49, %52 : vector<8x8xf32>
    %cst_27 = arith.constant dense<0xFF800000> : vector<8xf32>
    %54 = vector.multi_reduction <maximumf>, %53, %cst_27 [1] : vector<8x8xf32> to vector<8xf32>
    %55 = vector.shape_cast %54 : vector<8xf32> to vector<8x1xf32>
    %56 = vector.broadcast %55 : vector<8x1xf32> to vector<8x8xf32>
    %57 = arith.subf %53, %56 : vector<8x8xf32>
    %58 = arith.truncf %57 : vector<8x8xf32> to vector<8x8xbf16>
    %59 = math.exp %58 : vector<8x8xbf16>
    %60 = arith.extf %59 : vector<8x8xbf16> to vector<8x8xf32>
    %cst_28 = arith.constant dense<0.000000e+00> : vector<8xf32>
    %61 = vector.multi_reduction <add>, %60, %cst_28 [1] : vector<8x8xf32> to vector<8xf32>
    %62 = vector.shape_cast %61 : vector<8xf32> to vector<8x1xf32>
    %63 = tpu.reciprocal %62 {approx = true} : vector<8x1xf32> -> vector<8x1xf32>
    %64 = vector.shape_cast %59 : vector<8x8xbf16> to vector<1x8x8xbf16>
    %65 = vector.broadcast %64 : vector<1x8x8xbf16> to vector<3x8x8xbf16>
    %66 = arith.mulf %65, %16 : vector<3x8x8xbf16>
    %67 = vector.shape_cast %66 : vector<3x8x8xbf16> to vector<24x8xbf16>
    %cst_29 = arith.constant dense<0.000000e+00> : vector<24x3xf32>
    %68 = tpu.matmul %67, %48, %cst_29 {dimension_numbers = #tpu.dot_dimension_numbers<[1], [0], [0], [1], [0, 0, 1, 1], [], []>} : vector<24x8xbf16>, vector<8x3xbf16>, vector<24x3xf32> -> vector<24x3xf32>
    %69 = tpu.concatenate %63, %63, %63 in 0 : vector<8x1xf32>, vector<8x1xf32>, vector<8x1xf32> -> vector<24x1xf32>
    %c0_30 = arith.constant 0 : index
    %c0_31 = arith.constant 0 : index
    %70 = vector.load %arg9[%c0_30, %c0_31] : memref<24x3xf32, #tpu.memory_space<vmem>>, vector<24x3xf32>
    %71 = vector.broadcast %69 : vector<24x1xf32> to vector<24x3xf32>
    %72 = arith.mulf %68, %71 : vector<24x3xf32>
    %73 = arith.addf %70, %72 : vector<24x3xf32>
    %c0_32 = arith.constant 0 : index
    %c0_33 = arith.constant 0 : index
    %74 = vector.load %arg9[%c0_32, %c0_33] : memref<24x3xf32, #tpu.memory_space<vmem>>, vector<24x3xf32>
    tpu.vector_store %arg9[%c0_32, %c0_33], %73 {strides = array<i32>} : memref<24x3xf32, #tpu.memory_space<vmem>>, vector<24x3xf32>,
    %75 = vector.extract_strided_slice %14 {offsets = [0, 38], sizes = [8, 8], strides = [1, 1]} : vector<8x76xbf16> to vector<8x8xbf16>
    %76 = vector.extract_strided_slice %14 {offsets = [0, 46], sizes = [8, 8], strides = [1, 1]} : vector<8x76xbf16> to vector<8x8xbf16>
    %77 = vector.extract_strided_slice %14 {offsets = [0, 54], sizes = [8, 3], strides = [1, 1]} : vector<8x76xbf16> to vector<8x3xbf16>
    %cst_34 = arith.constant dense<0.000000e+00> : vector<8x8xf32>
    %78 = tpu.matmul %75, %76, %cst_34 {dimension_numbers = #tpu.dot_dimension_numbers<[1], [1], [0], [0], [0, 0, 1, 0], [], []>} : vector<8x8xbf16>, vector<8x8xbf16>, vector<8x8xf32> -> vector<8x8xf32>
    %c0_35 = arith.constant 0 : index
    %c2 = arith.constant 2 : index
    %c0_36 = arith.constant 0 : index
    %c0_37 = arith.constant 0 : index
    %79 = vector.load %arg3[%c0_35, %c2, %c0_36, %c0_37] : memref<1x4x8x8xbf16, #tpu.memory_space<vmem>>, vector<1x1x8x8xbf16>
    %80 = vector.shape_cast %79 : vector<1x1x8x8xbf16> to vector<8x8xbf16>
    %81 = arith.extf %80 : vector<8x8xbf16> to vector<8x8xf32>
    %82 = arith.addf %78, %81 : vector<8x8xf32>
    %cst_38 = arith.constant dense<0xFF800000> : vector<8xf32>
    %83 = vector.multi_reduction <maximumf>, %82, %cst_38 [1] : vector<8x8xf32> to vector<8xf32>
    %84 = vector.shape_cast %83 : vector<8xf32> to vector<8x1xf32>
    %85 = vector.broadcast %84 : vector<8x1xf32> to vector<8x8xf32>
    %86 = arith.subf %82, %85 : vector<8x8xf32>
    %87 = arith.truncf %86 : vector<8x8xf32> to vector<8x8xbf16>
    %88 = math.exp %87 : vector<8x8xbf16>
    %89 = arith.extf %88 : vector<8x8xbf16> to vector<8x8xf32>
    %cst_39 = arith.constant dense<0.000000e+00> : vector<8xf32>
    %90 = vector.multi_reduction <add>, %89, %cst_39 [1] : vector<8x8xf32> to vector<8xf32>
    %91 = vector.shape_cast %90 : vector<8xf32> to vector<8x1xf32>
    %92 = tpu.reciprocal %91 {approx = true} : vector<8x1xf32> -> vector<8x1xf32>
    %93 = vector.shape_cast %88 : vector<8x8xbf16> to vector<1x8x8xbf16>
    %94 = vector.broadcast %93 : vector<1x8x8xbf16> to vector<3x8x8xbf16>
    %95 = arith.mulf %94, %16 : vector<3x8x8xbf16>
    %96 = vector.shape_cast %95 : vector<3x8x8xbf16> to vector<24x8xbf16>
    %cst_40 = arith.constant dense<0.000000e+00> : vector<24x3xf32>
    %97 = tpu.matmul %96, %77, %cst_40 {dimension_numbers = #tpu.dot_dimension_numbers<[1], [0], [0], [1], [0, 0, 1, 1], [], []>} : vector<24x8xbf16>, vector<8x3xbf16>, vector<24x3xf32> -> vector<24x3xf32>
    %98 = tpu.concatenate %92, %92, %92 in 0 : vector<8x1xf32>, vector<8x1xf32>, vector<8x1xf32> -> vector<24x1xf32>
    %c0_41 = arith.constant 0 : index
    %c0_42 = arith.constant 0 : index
    %99 = vector.load %arg9[%c0_41, %c0_42] : memref<24x3xf32, #tpu.memory_space<vmem>>, vector<24x3xf32>
    %100 = vector.broadcast %98 : vector<24x1xf32> to vector<24x3xf32>
    %101 = arith.mulf %97, %100 : vector<24x3xf32>
    %102 = arith.addf %99, %101 : vector<24x3xf32>
    %c0_43 = arith.constant 0 : index
    %c0_44 = arith.constant 0 : index
    %103 = vector.load %arg9[%c0_43, %c0_44] : memref<24x3xf32, #tpu.memory_space<vmem>>, vector<24x3xf32>
    tpu.vector_store %arg9[%c0_43, %c0_44], %102 {strides = array<i32>} : memref<24x3xf32, #tpu.memory_space<vmem>>, vector<24x3xf32>,
    %104 = vector.extract_strided_slice %14 {offsets = [0, 57], sizes = [8, 8], strides = [1, 1]} : vector<8x76xbf16> to vector<8x8xbf16>
    %105 = vector.extract_strided_slice %14 {offsets = [0, 65], sizes = [8, 8], strides = [1, 1]} : vector<8x76xbf16> to vector<8x8xbf16>
    %106 = vector.extract_strided_slice %14 {offsets = [0, 73], sizes = [8, 3], strides = [1, 1]} : vector<8x76xbf16> to vector<8x3xbf16>
    %cst_45 = arith.constant dense<0.000000e+00> : vector<8x8xf32>
    %107 = tpu.matmul %104, %105, %cst_45 {dimension_numbers = #tpu.dot_dimension_numbers<[1], [1], [0], [0], [0, 0, 1, 0], [], []>} : vector<8x8xbf16>, vector<8x8xbf16>, vector<8x8xf32> -> vector<8x8xf32>
    %c0_46 = arith.constant 0 : index
    %c3 = arith.constant 3 : index
    %c0_47 = arith.constant 0 : index
    %c0_48 = arith.constant 0 : index
    %108 = vector.load %arg3[%c0_46, %c3, %c0_47, %c0_48] : memref<1x4x8x8xbf16, #tpu.memory_space<vmem>>, vector<1x1x8x8xbf16>
    %109 = vector.shape_cast %108 : vector<1x1x8x8xbf16> to vector<8x8xbf16>
    %110 = arith.extf %109 : vector<8x8xbf16> to vector<8x8xf32>
    %111 = arith.addf %107, %110 : vector<8x8xf32>
    %cst_49 = arith.constant dense<0xFF800000> : vector<8xf32>
    %112 = vector.multi_reduction <maximumf>, %111, %cst_49 [1] : vector<8x8xf32> to vector<8xf32>
    %113 = vector.shape_cast %112 : vector<8xf32> to vector<8x1xf32>
    %114 = vector.broadcast %113 : vector<8x1xf32> to vector<8x8xf32>
    %115 = arith.subf %111, %114 : vector<8x8xf32>
    %116 = arith.truncf %115 : vector<8x8xf32> to vector<8x8xbf16>
    %117 = math.exp %116 : vector<8x8xbf16>
    %118 = arith.extf %117 : vector<8x8xbf16> to vector<8x8xf32>
    %cst_50 = arith.constant dense<0.000000e+00> : vector<8xf32>
    %119 = vector.multi_reduction <add>, %118, %cst_50 [1] : vector<8x8xf32> to vector<8xf32>
    %120 = vector.shape_cast %119 : vector<8xf32> to vector<8x1xf32>
    %121 = tpu.reciprocal %120 {approx = true} : vector<8x1xf32> -> vector<8x1xf32>
    %122 = vector.shape_cast %117 : vector<8x8xbf16> to vector<1x8x8xbf16>
    %123 = vector.broadcast %122 : vector<1x8x8xbf16> to vector<3x8x8xbf16>
    %124 = arith.mulf %123, %16 : vector<3x8x8xbf16>
    %125 = vector.shape_cast %124 : vector<3x8x8xbf16> to vector<24x8xbf16>
    %cst_51 = arith.constant dense<0.000000e+00> : vector<24x3xf32>
    %126 = tpu.matmul %125, %106, %cst_51 {dimension_numbers = #tpu.dot_dimension_numbers<[1], [0], [0], [1], [0, 0, 1, 1], [], []>} : vector<24x8xbf16>, vector<8x3xbf16>, vector<24x3xf32> -> vector<24x3xf32>
    %127 = tpu.concatenate %121, %121, %121 in 0 : vector<8x1xf32>, vector<8x1xf32>, vector<8x1xf32> -> vector<24x1xf32>
    %c0_52 = arith.constant 0 : index
    %c0_53 = arith.constant 0 : index
    %128 = vector.load %arg9[%c0_52, %c0_53] : memref<24x3xf32, #tpu.memory_space<vmem>>, vector<24x3xf32>
    %129 = vector.broadcast %127 : vector<24x1xf32> to vector<24x3xf32>
    %130 = arith.mulf %126, %129 : vector<24x3xf32>
    %131 = arith.addf %128, %130 : vector<24x3xf32>
    %c0_54 = arith.constant 0 : index
    %c0_55 = arith.constant 0 : index
    %132 = vector.load %arg9[%c0_54, %c0_55] : memref<24x3xf32, #tpu.memory_space<vmem>>, vector<24x3xf32>
    tpu.vector_store %arg9[%c0_54, %c0_55], %131 {strides = array<i32>} : memref<24x3xf32, #tpu.memory_space<vmem>>, vector<24x3xf32>,
    %c0_i32_56 = arith.constant 0 : i32
    %133 = arith.cmpi eq, %arg1, %c0_i32_56 : i32
    %134 = arith.extui %133 : i1 to i32
    %c0_i32_57 = arith.constant 0 : i32
    %135 = arith.cmpi ne, %134, %c0_i32_57 : i32
    scf.if %135 {
      %c0_58 = arith.constant 0 : index
      %c0_59 = arith.constant 0 : index
      %136 = vector.load %arg9[%c0_58, %c0_59] : memref<24x3xf32, #tpu.memory_space<vmem>>, vector<24x3xf32>
      %137 = vector.shape_cast %136 : vector<24x3xf32> to vector<3x8x3xf32>
      %138 = tpu.iota {dimensions = array<i32: 0>} : vector<3x1x3xi32>
      %139 = tpu.iota {dimensions = array<i32: 2>} : vector<3x1x3xi32>
      %140 = arith.cmpi eq, %138, %139 : vector<3x1x3xi32>
      %141 = arith.extui %140 : vector<3x1x3xi1> to vector<3x1x3xi32>
      %142 = arith.sitofp %141 : vector<3x1x3xi32> to vector<3x1x3xf32>
      %143 = vector.broadcast %142 : vector<3x1x3xf32> to vector<3x8x3xf32>
      %144 = arith.mulf %137, %143 : vector<3x8x3xf32>
      %cst_60 = arith.constant dense<0.000000e+00> : vector<3x8xf32>
      %145 = vector.multi_reduction <add>, %144, %cst_60 [2] : vector<3x8x3xf32> to vector<3x8xf32>
      %c0_61 = arith.constant 0 : index
      %c0_62 = arith.constant 0 : index
      %146 = vector.load %arg7[%c0_61, %c0_62] : memref<3x1xf32, #tpu.memory_space<vmem>>, vector<3x1xf32>
      %147 = vector.broadcast %146 : vector<3x1xf32> to vector<3x8xf32>
      %148 = arith.addf %145, %147 : vector<3x8xf32>
      %c0_63 = arith.constant 0 : index
      %c0_64 = arith.constant 0 : index
      %c0_65 = arith.constant 0 : index
      %149 = vector.load %arg8[%c0_63, %c0_64, %c0_65] : memref<1x3x8xf32, #tpu.memory_space<vmem>>, vector<1x3x8xf32>
      %150 = vector.shape_cast %149 : vector<1x3x8xf32> to vector<3x8xf32>
      %151 = vector.shape_cast %148 : vector<3x8xf32> to vector<1x3x8xf32>
      tpu.vector_store %arg8[%c0_63, %c0_64, %c0_65], %151 {strides = array<i32>} : memref<1x3x8xf32, #tpu.memory_space<vmem>>, vector<1x3x8xf32>,
    } else {
    }
    return
  }
  func.func @transform_0(%arg0: i32, %arg1: i32) -> (i32, i32, i32) {
    %c0_i32 = arith.constant 0 : i32
    %c0_i32_0 = arith.constant 0 : i32
    %c0_i32_1 = arith.constant 0 : i32
    return %arg0, %c0_i32, %c0_i32_0 : i32, i32, i32
  }
  func.func @transform_1(%arg0: i32, %arg1: i32) -> (i32, i32, i32, i32) {
    %c0_i32 = arith.constant 0 : i32
    %c0_i32_0 = arith.constant 0 : i32
    %c0_i32_1 = arith.constant 0 : i32
    return %arg0, %arg1, %c0_i32, %c0_i32_0 : i32, i32, i32, i32
  }
  func.func @transform_2(%arg0: i32, %arg1: i32) -> (i32, i32, i32, i32) {
    %c0_i32 = arith.constant 0 : i32
    %c0_i32_0 = arith.constant 0 : i32
    %c0_i32_1 = arith.constant 0 : i32
    %c0_i32_2 = arith.constant 0 : i32
    return %arg0, %c0_i32, %c0_i32_0, %c0_i32_1 : i32, i32, i32, i32
  }
  func.func @transform_3(%arg0: i32, %arg1: i32) -> (i32, i32, i32) {
    %c0_i32 = arith.constant 0 : i32
    %c0_i32_0 = arith.constant 0 : i32
    %c0_i32_1 = arith.constant 0 : i32
    %c0_i32_2 = arith.constant 0 : i32
    return %c0_i32, %c0_i32_0, %c0_i32_1 : i32, i32, i32
  }
  func.func @transform_4(%arg0: i32, %arg1: i32) -> (i32, i32, i32) {
    %c0_i32 = arith.constant 0 : i32
    %c0_i32_0 = arith.constant 0 : i32
    %c0_i32_1 = arith.constant 0 : i32
    %c0_i32_2 = arith.constant 0 : i32
    return %c0_i32, %c0_i32_0, %c0_i32_1 : i32, i32, i32
  }
  func.func @transform_5(%arg0: i32, %arg1: i32) -> (i32, i32) {
    %c0_i32 = arith.constant 0 : i32
    %c0_i32_0 = arith.constant 0 : i32
    %c0_i32_1 = arith.constant 0 : i32
    return %c0_i32, %c0_i32_0 : i32, i32
  }
  func.func @transform_6(%arg0: i32, %arg1: i32) -> (i32, i32, i32) {
    %c0_i32 = arith.constant 0 : i32
    %c0_i32_0 = arith.constant 0 : i32
    %c0_i32_1 = arith.constant 0 : i32
    return %arg0, %c0_i32, %c0_i32_0 : i32, i32, i32
  }
}

</mosaic_0001>

<bundles_post_ra>
// kernel: tpu_custom_call.1
= control target key start
LH: loop header
LB: loop body
LE: loop exit
PB: predicated region body
PF: predicated region fallthrough
CT: control target
= control target key end

     0   :  { %s2038_s0 = inlined_call_operand.hbm [shape: bf16[2,8,32], index: 0, kind: input, shape index: {}]   ;;  %s2039_s1 = inlined_call_operand.hbm [shape: bf16[2,4,8,8], index: 1, kind: input, shape index: {}]   ;;  %s2040_s2 = inlined_call_operand.hbm [shape: bf16[2,3,8,8], index: 2, kind: input, shape index: {}]   ;;  %s2041_s3 = inlined_call_operand.vmem [shape: bf16[1,32,76], index: 3, kind: input, shape index: {}]   ;;  %s2042_s4 = inlined_call_operand.vmem [shape: f32[1,1,76], index: 4, kind: input, shape index: {}]   ;;  %s2043_s5 = inlined_call_operand.vmem [shape: f32[3,1], index: 5, kind: input, shape index: {}]   ;;  %s2044_s6 = inlined_call_operand.vmem [shape: f32[2,3,8], index: 6, kind: output, shape index: {}]  }
   0x1   :  { %2049 = sst [smem:[#allocation10_spill]] %s2039_s1 }
   0x2   :  { %11 = vsyncpa [#allocation4], 0 }
   0x3   :  { %13 = vsyncpa [#allocation4 + $0x1], 0 }
   0x4   :  { %14 = vsyncpa [#allocation6], 0 }
   0x5   :  { %16 = vsyncpa [#allocation6 + $0x1], 0  ;;  %s1698_s21 = smov 0   ;;  %s1700_s22 = smov 0  }
   0x6   :  { %s1702_s23 = smov 0   ;;  %s1704_s24 = smov 0  }
   0x7   :  { %s1706_s25 = smov 0   ;;  %s1708_s26 = smov 0  }
   0x8 LB: > { %s2046_s27 = sadd.s32 4294967295, %s1642_s26   ;;  %s34_s28 = sadd.s32 1, %s1638_s25  ;;  %s1642_s26 = sphi %s1708_s26, %s22_s26   ;;  %s1638_s25 = sphi %s1706_s25, %s2065_s25   ;;  %s1634_s24 = sphi %s1704_s24, %s2064_s24   ;;  %s1630_s23 = sphi %s1702_s23, %s2063_s23   ;;  %s1626_s22 = sphi %s1700_s22, %s2062_s22   ;;  %s1622_s21 = sphi %s1698_s21, %s2061_s21  }
   0x9   : > { %p36_p0 = scmp.ge.s32.totalorder %s34_s28, 2  ;;  %s41_s29 = sadd.s32 1, %s1630_s23 }
   0xa   : > { %p48_p1 = scmp.ne.s32.totalorder %s1630_s23, %s1626_s22  ;;  %p49_p2 = scmp.eq.s32.totalorder %s1642_s26, 0 }
   0xb   : > { %s2067_s28 = smov (%p36_p0, %s34_s28), 0  ;;  %p54_p4 = scmp.ne.s32.totalorder %s1626_s22, %s1622_s21 }
   0xc   : > { %p50_p3 = por %p49_p2, %p48_p1  ;;  %s38_s30 = ssub.s32 %s1638_s25, %s2067_s28 }
   0xd   : > { %p55_p5 = scmp.eq.s32.totalorder %s2046_s27, 0  ;;  %p39_p6 = scmp.eq.s32.totalorder %s38_s30, 0 }
   0xe   : > { %p1413_p8 = scmp.lt.s32.totalorder %s1642_s26, 2  ;;  %s1748_s9 = sand.u32 1, %s1630_s23  }
   0xf   : > { %p1739_p7 = por %p55_p5, %p54_p4  ;;  %s248_s11 = sand.u32 1, %s1642_s26  }
  0x10   : > { %s1745_s8 = scalar_select %p39_p6, %s1630_s23, %s41_s29  }
  0x11   : > { %s2050_s7 = scalar_select %p1739_p7, 1, 0 }
  0x12   : > { %p1750_p9 = pnand %p1413_p8, %p50_p3  ;;  %s1270_s12 = sshll.u32 %s1748_s9, 4 }
  0x13   : > { %s1310_s13 = sshll.u32 %s1638_s25, 8  ;;  %s2052_s1 = sld [smem:[#allocation10_spill]] }
  0x14   : > { %s252_s17 = scalar_lea.vmem [#allocation5], %s1270_s12  ;;  %s1765_s19 = scalar_lea.sflag [#allocation6], %s248_s11 }
  0x15   : > { %s261_s18 = sshll.u32 %s252_s17, 4  ;;  %p1771_p12 = pneg %p1750_p9  ;;  %s1762_s18 = int_to_ptr.vmem [resolvable:$true] %s261_s18 }
  0x19   : > { %s1760_s16 = scalar_lea.hbm %s2052_s1, %s1310_s13  ;;  %s1503_s12 = scalar_lea.hbm %s2052_s1, 512 }
  0x1a   : > { %s1498_s20 = scalar_lea.hbm %s1760_s16, 256  ;;  %p1504_p1 = scmp.lt.u32.totalorder %s1760_s16, %s2052_s1 }
  0x1b   : > { %p1499_p11 = scmp.ne.s32.totalorder %s1760_s16, %s1498_s20  ;;  %p1505_p2 = scmp.lt.u32.totalorder %s1503_s12, %s1498_s20 }
  0x1c   : > { %p1507_p4 = scmp.lt.u32.totalorder %s1498_s20, %s1760_s16 }
  0x1d   : > { %p1501_p13 = pnand %p1771_p12, %p1499_p11  ;;  %p1506_p3 = por %p1505_p2, %p1504_p1 }
  0x1f   : > { %p1502_p0 = pneg %p1501_p13  ;;  %p1508_p5 = por %p1507_p4, %p1506_p3 }
  0x21   : > { %p1509_p6 = pnand %p1508_p5, %p1502_p0 }
  0x23   : > { %1512 = shalt.err (!%p1509_p6)
}
  0x24   : > { %s1513_s11 = scalar_lea.vmem %s1762_s18, 256  ;;  %s1644_s15 = smov [#allocation5]  }
  0x25   : > { %p1514_p8 = scmp.ne.s32.totalorder %s1762_s18, %s1513_s11  ;;  %s1518_s17 = sshll.u32 %s1644_s15, 4  ;;  %s1519_s17 = int_to_ptr.vmem [resolvable:$false] %s1518_s17 }
  0x26   : > { %s1520_s29 = scalar_lea.vmem %s1519_s17, 512  ;;  %p1521_p10 = scmp.lt.s32.totalorder %s1762_s18, %s1519_s17 }
  0x27   : > { %p1516_p11 = pnand %p1514_p8, %p1771_p12  ;;  %p1522_p7 = scmp.lt.s32.totalorder %s1520_s29, %s1513_s11 }
  0x29   : > { %p1517_p13 = pneg %p1516_p11  ;;  %p1523_p1 = por %p1522_p7, %p1521_p10 }
  0x2b   : > { %p1524_p2 = pnand %p1523_p1, %p1517_p13 }
  0x2d   : > { %1527 = shalt.err (!%p1524_p2)
}
  0x2e   : > { %s2047_s20 = smov 64   ;;  %s2048_s30 = smov 4  }
  0x2f   : > { %1409 = dma.hbm_to_vmem [thread:$0]  (!%p1750_p9), %s1760_s16, 256, %s1762_s18, %s1765_s19, %s2047_s20, %s2047_s20, %s2048_s30  }
  0x30   : > { %p290_p7 = scmp.lt.s32.totalorder %s1642_s26, 3  ;;  %p2054_p10 = scmp.ge.s32.totalorder %s1642_s26, 1 }
  0x31   : > { %s1268_s13 = sshll.u32 %s1748_s9, 2  ;;  %s1269_s14 = sshll.u32 %s1638_s25, 6 }
  0x32   : > { %p1801_p0 = pnand %p2054_p10, %p290_p7  ;;  %s1810_s17 = scalar_lea.hbm %s2038_s0, %s1269_s14 }
  0x33   : > { %s234_s29 = scalar_lea.vmem [#allocation3], %s1268_s13  ;;  %s1394_s16 = smul.u32 12, %s1748_s9 }
  0x34   : > { %s2055_s12 = scalar_select %p1801_p0, 1, 0 }
  0x35   : > { %s241_s27 = sshll.u32 %s234_s29, 4  ;;  %s231_s18 = scalar_lea.sflag [#allocation4], %s1748_s9  ;;  %s1812_s27 = int_to_ptr.vmem [resolvable:$true] %s241_s27 }
  0x36   : > { %s1528_s20 = scalar_lea.hbm %s1810_s17, 64  ;;  %s1533_s14 = scalar_lea.hbm %s2038_s0, 128 }
  0x37   : > { %p1529_p3 = scmp.ne.s32.totalorder %s1810_s17, %s1528_s20  ;;  %p1534_p6 = scmp.lt.u32.totalorder %s1810_s17, %s2038_s0 }
  0x38   : > { %p1535_p8 = scmp.lt.u32.totalorder %s1533_s14, %s1528_s20  ;;  %p1537_p13 = scmp.lt.u32.totalorder %s1528_s20, %s1810_s17 }
  0x39   : > { %p1531_p4 = pnand %p1529_p3, %p1771_p12 }
  0x3a   : > { %p1536_p11 = por %p1535_p8, %p1534_p6 }
  0x3b   : > { %p1532_p5 = pneg %p1531_p4 }
  0x3c   : > { %p1538_p1 = por %p1537_p13, %p1536_p11 }
  0x3e   : > { %p1539_p2 = pnand %p1538_p1, %p1532_p5 }
  0x40   : > { %1542 = shalt.err (!%p1539_p2)
}
  0x41   : > { %s1543_s13 = scalar_lea.vmem %s1812_s27, 64  ;;  %s1647_s1 = smov [#allocation3]  }
  0x42   : > { %p1544_p7 = scmp.ne.s32.totalorder %s1812_s27, %s1543_s13  ;;  %s1548_s30 = sshll.u32 %s1647_s1, 4  ;;  %s1549_s30 = int_to_ptr.vmem [resolvable:$false] %s1548_s30 }
  0x43   : > { %s1550_s29 = scalar_lea.vmem %s1549_s30, 128  ;;  %p1551_p4 = scmp.lt.s32.totalorder %s1812_s27, %s1549_s30 }
  0x44   : > { %p1546_p10 = pnand %p1544_p7, %p1771_p12  ;;  %p1552_p0 = scmp.lt.s32.totalorder %s1550_s29, %s1543_s13 }
  0x46   : > { %p1547_p3 = pneg %p1546_p10  ;;  %p1553_p6 = por %p1552_p0, %p1551_p4 }
  0x48   : > { %p1554_p8 = pnand %p1553_p6, %p1547_p3 }
  0x4a   : > { %1557 = shalt.err (!%p1554_p8)
}
  0x4b   : > { %1406 = dma.hbm_to_vmem [thread:$0]  (!%p1750_p9), %s1810_s17, 64, %s1812_s27, %s231_s18  }
  0x4c   : > { %s1395_s20 = smul.u32 192, %s1638_s25  ;;  %s275_s14 = scalar_lea.vmem [#allocation7], %s1394_s16 }
  0x4d   : > { %s282_s11 = sshll.u32 %s275_s14, 4  ;;  %s1563_s17 = scalar_lea.hbm %s2040_s2, 384  ;;  %s1845_s11 = int_to_ptr.vmem [resolvable:$true] %s282_s11 }
  0x4e   : > { %s1843_s30 = scalar_lea.hbm %s2040_s2, %s1395_s20 }
  0x4f   : > { %s1558_s13 = scalar_lea.hbm %s1843_s30, 192  ;;  %p1564_p13 = scmp.lt.u32.totalorder %s1843_s30, %s2040_s2 }
  0x50   : > { %p1559_p0 = scmp.ne.s32.totalorder %s1843_s30, %s1558_s13  ;;  %p1565_p1 = scmp.lt.u32.totalorder %s1563_s17, %s1558_s13 }
  0x51   : > { %p1567_p7 = scmp.lt.u32.totalorder %s1558_s13, %s1843_s30 }
  0x52   : > { %p1561_p5 = pnand %p1559_p0, %p1771_p12  ;;  %p1566_p2 = por %p1565_p1, %p1564_p13 }
  0x54   : > { %p1562_p11 = pneg %p1561_p5  ;;  %p1568_p10 = por %p1567_p7, %p1566_p2 }
  0x56   : > { %p1569_p3 = pnand %p1568_p10, %p1562_p11 }
  0x58   : > { %1572 = shalt.err (!%p1569_p3)
}
  0x59   : > { %s1573_s29 = scalar_lea.vmem %s1845_s11, 192  ;;  %s1648_s20 = smov [#allocation7]  }
  0x5a   : > { %p1574_p4 = scmp.ne.s32.totalorder %s1845_s11, %s1573_s29  ;;  %s1578_s14 = sshll.u32 %s1648_s20, 4  ;;  %s1579_s14 = int_to_ptr.vmem [resolvable:$false] %s1578_s14 }
  0x5b   : > { %s1580_s15 = scalar_lea.vmem %s1579_s14, 384  ;;  %p1581_p0 = scmp.lt.s32.totalorder %s1845_s11, %s1579_s14 }
  0x5c   : > { %p1576_p6 = pnand %p1574_p4, %p1771_p12  ;;  %p1582_p5 = scmp.lt.s32.totalorder %s1580_s15, %s1573_s29 }
  0x5e   : > { %p1577_p8 = pneg %p1576_p6  ;;  %p1583_p13 = por %p1582_p5, %p1581_p0 }
  0x60   : > { %p1584_p1 = pnand %p1583_p13, %p1577_p8 }
  0x62   : > { %1587 = shalt.err (!%p1584_p1)
}
  0x63   : > { %s2056_s1 = smov 4   ;;  %s2057_s13 = smov 64  }
  0x64   : > { %1412 = dma.hbm_to_vmem [thread:$0]  (!%p1750_p9), %s1843_s30, 192, %s1845_s11, %s1765_s19, %s2057_s13, %s2057_s13, %s2056_s1  }
  0x65   : > { %p2058_p12 = scmp.ne.s32.totalorder %s2055_s12, 0 }
  0x66   : > { %s1875_s21 = sand.u32 (!%p2058_p12), 1, %s1626_s22   ;;  %p2059_p11 = scmp.ne.s32.totalorder (!%p2058_p12), %s2050_s7, 0 }
  0x67   : > { %294 = sbr.rel (%p2058_p12) target bundleno = 1481 (0x5c9), region = 44  ;;  %s1275_s27 = sshll.u32 (!%p2058_p12), %s1875_s21, 2 }
  0x68   : > { %s297_s9 = scalar_lea.sflag (!%p2058_p12), [#allocation4], %s1875_s21  ;;  %s300_s17 = scalar_lea.vmem (!%p2058_p12), [#allocation3], %s1275_s27 }
  0x6e   : > { %1613 = dma.done.wait (%p2059_p11), %s297_s9, 64  }
  0x6f   : > { %1615 = vsyncadd (%p2059_p11), %s297_s9, 4294967232  ;;  %s2060_s10 = sadd.s32 4294967295, %s1642_s26   ;;  %s1276_s12 = sshll.u32 %s1875_s21, 4 }
  0x70   : > { %s305_s19 = sand.u32 1, %s2060_s10   ;;  %s1886_s30 = scalar_lea.vmem [#allocation5], %s1276_s12 }
  0x71   : > { %s306_s11 = scalar_lea.sflag [#allocation6], %s305_s19 }
  0x72   : > { %1617 = dma.done.wait (%p2059_p11), %s306_s11, 448  }
  0x73   : > { %1619 = vsyncadd (%p2059_p11), %s306_s11, 4294966848  ;;  %v1649_v0 = vmov 0.0   ;;  %vm1650_vm0 = vmmov 0   ;;  %v1480_v1 = vld [vmem:[%s2041_s3] sm:$0xff]   ;;  %v1481_v2 = vld [vmem:[%s2041_s3 + $0x8] sm:$0xff]   ;;  %vm398_vm1 = vcmask 261120  }
  0x74   : > { %1334 = vmatprep.subr.bf16.mxu0 %v1649_v0  ;;  %1338 = vmatprep.mubr.msk.bf16.mxu0 %vm1650_vm0, %v1649_v0  ;;  %v370_v3 = vld [vmem:[%s300_s17] sm:$0xf]  ;;  %v1278_v4 = vld [vmem:[%s2042_s4] ss:$0 sm:$0xff]  ;;  %s1651_s15 = smov 109   ;;  %s1652_s1 = smov 120  }
  0x75   : > { %1342 = vmatprep.subr.bf16.mxu1 %v1649_v0  ;;  %1344 = vmatprep.mubr.msk.bf16.mxu1 %vm1650_vm0, %v1649_v0  ;;  %s1653_s13 = smov 82   ;;  %s1654_s27 = smov 101   ;;  %vm451_vm2 = vcmask 64512   ;;  %v446_v22 = vld [vmem:[%s1886_s30] sm:$0xff]   ;;  %v1293_v35 = vld [vmem:[%s1886_s30 + $0x8] sm:$0xff]   ;;  %vm530_vm3 = vcmask 1043456  }
  0x76   : > { %1335 = vmatpush3.bf16.msra.mxu0 %v1480_v1  ;;  %s1655_s9 = smov 63   ;;  %s1656_s17 = smov 90   ;;  %v447_v23 = vunpack.c.l.bf16 %v446_v22  ;;  %v602_v30 = vunpack.c.h.bf16 %v446_v22  ;;  %v755_v38 = vunpack.c.l.bf16 %v1293_v35  ;;  %v908_v49 = vunpack.c.h.bf16 %v1293_v35 }
  0x77   : > { %1336 = vmatprep.subr.bf16.mxu0 %v1649_v0  ;;  %s1657_s10 = smov 71   ;;  %s1658_s19 = smov 93   ;;  %vm366_vm4 = vcmask 23552   ;;  %vm1135_vm8 = vcmask 1041409   ;;  %vm1137_vm9 = vcmask 1042434   ;;  %vm1140_vm10 = vcmask 59392  }
  0x78   : > { %s1659_s12 = smov 112   ;;  %s1660_s11 = smov 55   ;;  %367 = vst.msk [vmem:[#allocation2] sm:$0xff] %vm366_vm4, %v1649_v0  ;;  %368 = vst.msk [vmem:[#allocation2 + $0x8] sm:$0xff] %vm366_vm4, %v1649_v0 }
  0x79   : > { %s1661_s30 = smov 74   ;;  %s1396_s16 = smul.u32 12, %s1875_s21  ;;  %369 = vst.msk [vmem:[#allocation2 + $0x10] sm:$0xff] %vm366_vm4, %v1649_v0 }
  0x7a   : > { %1337 = vmatpush3.bf16.msra.mxu0 %v1481_v2  ;;  %p357_p9 = scmp.lt.s32.totalorder %s1634_s24, 1 }
  0x7b   : > { %s318_s18 = scalar_lea.vmem [#allocation7], %s1396_s16 }
  0x7c   : > { %v1949_v61 = vld [vmem:[%s318_s18] sm:$0xf]  ;;  %v1951_v62 = vld [vmem:[%s318_s18 + $0x4] sm:$0xf]  ;;  %v1953_v1 = vld [vmem:[%s318_s18 + $0x8] sm:$0xf] }
  0x7d   : > { %1339 = vmatmul.mubr.msk.bf16.vlgmr.msra.gmra.mrb[0].mxu0 %vm398_vm1, %v370_v3  ;;  %s2069_s24 = smov (!%p357_p9, %s1634_s24), 1 }
  0x7e   : > { %s1277_s7 = sshll.u32 %s2069_s24, 2 }
 0x150   : > { %v436_v5 = vpop.f32.mrb[0].mxu0 }
 0x151   : > { %v437_v6 = vadd.f32 %v1278_v4, %v436_v5  ;;  %v1340_v7 = vpop.f32.mrb[1].mxu0 }
 0x152   : > { %v439_v8 = vpop.f32.mrb[2].mxu0 }
 0x153   : > { %v1908_v9 = vpack.c.bf16 %v437_v6, %v437_v6  ;;  %v1341_v10 = vpop.f32.mrb[3].mxu0 }
 0x155   : > { %603 = vrot.lane.b32.xlu1 %v1908_v9, %s1651_s15  ;;  %449 = vrot.lane.b32.xlu0 %v1908_v9, %s1652_s1  ;;  %s360_s15 = scalar_lea.vmem %s2044_s6, %s1277_s7 }
 0x159   : > { %758 = vrot.lane.b32.xlu1 %v1908_v9, %s1653_s13  ;;  %605 = vrot.lane.b32.xlu0 %v1908_v9, %s1654_s27 }
 0x15d   : > { %911 = vrot.lane.b32.xlu1 %v1908_v9, %s1655_s9  ;;  %756 = vrot.lane.b32.xlu0 %v1908_v9, %s1656_s17 }
 0x161   : > { %909 = vrot.lane.b32.xlu0 %v1908_v9, %s1657_s10 }
 0x1c7   : > { %v450_v11 = vpop.permute.xlu0 %449  ;;  %v604_v14 = vpop.permute.xlu1 %603 }
 0x1c8   : > { %v456_v12 = vsel %vm451_vm2, %v450_v11, 0 }
 0x1c9   : > { %1343 = vmatpush3.bf16.xpose.msra.mxu1 %v456_v12 }
 0x1ca   : > { %1354 = vmatprep.subr.bf16.mxu1 %v1649_v0 }
 0x1cb   : > { %v606_v13 = vpop.permute.xlu0 %605  ;;  %v759_v16 = vpop.permute.xlu1 %758 }
 0x1cc   : > { %v611_v15 = vsel %vm451_vm2, %v606_v13, 0  ;;  %v764_v17 = vsel %vm451_vm2, %v759_v16, 0 }
 0x1cf   : > { %v912_v18 = vpop.permute.xlu1 %911  ;;  %v757_v19 = vpop.permute.xlu0 %756 }
 0x1d0   : > { %1345 = vmatmul.mubr.msk.bf16.vlgmr.msra.gmra.mrb[0].mxu1 %vm451_vm2, %v1908_v9  ;;  %v917_v20 = vsel %vm451_vm2, %v912_v18, 0 }
 0x1d1   : > { %1355 = vmatpush3.bf16.xpose.msra.mxu1 %v611_v15  ;;  %1356 = vmatprep.mubr.msk.bf16.mxu1 %vm1650_vm0, %v1649_v0 }
 0x1d2   : > { %1366 = vmatprep.subr.bf16.mxu1 %v1649_v0 }
 0x1d3   : > { %v910_v21 = vpop.permute.xlu0 %909 }
 0x1d8   : > { %1357 = vmatmul.mubr.msk.bf16.vlgmr.msra.gmra.mrb[4].mxu1 %vm451_vm2, %v604_v14 }
 0x1d9   : > { %1367 = vmatpush3.bf16.xpose.msra.mxu1 %v764_v17  ;;  %1368 = vmatprep.mubr.msk.bf16.mxu1 %vm1650_vm0, %v1649_v0 }
 0x1da   : > { %1378 = vmatprep.subr.bf16.mxu1 %v1649_v0 }
 0x1e0   : > { %1369 = vmatmul.mubr.msk.bf16.vlgmr.msra.gmra.mrb[8].mxu1 %vm451_vm2, %v757_v19 }
 0x1e1   : > { %1379 = vmatpush3.bf16.xpose.msra.mxu1 %v917_v20  ;;  %1380 = vmatprep.mubr.msk.bf16.mxu1 %vm1650_vm0, %v1649_v0 }
 0x1e8   : > { %1381 = vmatmul.mubr.msk.bf16.vlgmr.msra.gmra.mrb[12].mxu1 %vm451_vm2, %v910_v21 }
 0x2a3   : > { %v492_v24 = vpop.f32.mrb[0].mxu1 }
 0x2a4   : > { %v493_v25 = vadd.f32 %v492_v24, %v447_v23  ;;  %v1346_v26 = vpop.f32.mrb[1].mxu1 }
 0x2a5   : > { %v495_v27 = vpop.f32.mrb[2].mxu1 }
 0x2a6   : > { %v1347_v28 = vpop.f32.mrb[3].mxu1  ;;  %v498_v29 = vsel %vm451_vm2, %v493_v25, -inf }
 0x2a7   : > { %499 = vmax.xlane.f32.xlu1 %v498_v29 }
 0x2ab   : > { %v647_v31 = vpop.f32.mrb[4].mxu1 }
 0x2ac   : > { %v648_v32 = vadd.f32 %v647_v31, %v602_v30  ;;  %v1358_v33 = vpop.f32.mrb[5].mxu1  ;;  %v1662_v30 = vmov 0  }
 0x2ad   : > { %v650_v34 = vpop.f32.mrb[6].mxu1  ;;  %1478 = vset.pattern.permute.xlu0 %v1662_v30  ;;  %1479 = vset.pattern.permute.xlu1 %v1662_v30 }
 0x2ae   : > { %v1359_v36 = vpop.f32.mrb[7].mxu1  ;;  %v653_v37 = vsel %vm451_vm2, %v648_v32, -inf }
 0x2af   : > { %654 = vmax.xlane.f32.xlu0 %v653_v37 }
 0x2b3   : > { %v800_v39 = vpop.f32.mrb[8].mxu1 }
 0x2b4   : > { %v801_v40 = vadd.f32 %v800_v39, %v755_v38  ;;  %v1370_v41 = vpop.f32.mrb[9].mxu1 }
 0x2b5   : > { %v803_v42 = vpop.f32.mrb[10].mxu1 }
 0x2b6   : > { %v1371_v43 = vpop.f32.mrb[11].mxu1  ;;  %v806_v44 = vsel %vm451_vm2, %v801_v40, -inf }
 0x2b7   : > { %807 = vmax.xlane.f32.xlu0 %v806_v44 }
 0x2b8   : > { %677 = vrot.lane.b32.xlu1 %v1908_v9, %s1658_s19 }
 0x2bb   : > { %v953_v45 = vpop.f32.mrb[12].mxu1 }
 0x2bc   : > { %v1382_v46 = vpop.f32.mrb[13].mxu1  ;;  %v1943_v50 = vadd.f32 %v953_v45, %v908_v49 }
 0x2bd   : > { %v956_v47 = vpop.f32.mrb[14].mxu1 }
 0x2be   : > { %v1383_v48 = vpop.f32.mrb[15].mxu1  ;;  %v959_v51 = vsel %vm451_vm2, %v1943_v50, -inf }
 0x2cd   : > { %522 = vrot.lane.b32.xlu0 %v1908_v9, %s1659_s12 }
 0x2d1   : > { %983 = vrot.lane.b32.xlu0 %v1908_v9, %s1660_s11 }
 0x2dc   : > { %960 = vmax.xlane.f32.xlu1 %v959_v51 }
 0x2ed   : > { %830 = vrot.lane.b32.xlu1 %v1908_v9, %s1661_s30 }
 0x334   : > { %v500_v52 = vpop.xlane.xlu1 %499 }
 0x335   : > { %v501_v53 = vsub.f32 %v493_v25, %v500_v52 }
 0x337   : > { %v502_v54 = vpack.c.bf16 %v501_v53, %v501_v53 }
 0x338   : > { %v678_v13 = vpop.permute.xlu1 %677 }
 0x339   : > { %v504_v55 = vmul.bf16 1069105081, %v502_v54  ;;  %v686_v15 = vsel %vm530_vm3, %v678_v13, 0 }
 0x33b   : > { %1482 = vpow.bf16 %v504_v55 }
 0x33c   : > { %v655_v56 = vpop.xlane.xlu0 %654 }
 0x33d   : > { %v656_v57 = vsub.f32 %v648_v32, %v655_v56 }
 0x33f   : > { %v657_v58 = vpack.c.bf16 %v656_v57, %v656_v57 }
 0x341   : > { %v659_v59 = vmul.bf16 1069105081, %v657_v58 }
 0x343   : > { %1484 = vpow.bf16 %v659_v59 }
 0x344   : > { %v808_v60 = vpop.xlane.xlu0 %807 }
 0x345   : > { %v809_v63 = vsub.f32 %v801_v40, %v808_v60 }
 0x346   : > { %v1483_v2 = vpop.eup %1482 }
 0x347   : > { %v810_v3 = vpack.c.bf16 %v809_v63, %v809_v63  ;;  %v506_v4 = vunpack.c.l.bf16 %v1483_v2  ;;  %v511_v5 = vmul.bf16 %v1483_v2, %v1949_v61  ;;  %v512_v6 = vmul.bf16 %v1483_v2, %v1951_v62 }
 0x348   : > { %v523_v7 = vpop.permute.xlu0 %522  ;;  %v513_v8 = vmul.bf16 %v1483_v2, %v1953_v1 }
 0x349   : > { %v812_v9 = vmul.bf16 1069105081, %v810_v3  ;;  %v532_v10 = vsel %vm530_vm3, %v523_v7, 0  ;;  %1390 = vmatprep.subr.msk.bf16.mxu0 %vm530_vm3, %v523_v7  ;;  %v507_v11 = vsel %vm451_vm2, %v506_v4, 0.0  ;;  %v1283_v12 = vcombine.low %v511_v5, %v512_v6 }
 0x34a   : > { %508 = vadd.xlane.f32.xlu1 %v507_v11  ;;  %1349 = vmatpush3.bf16.msra.mxu0 %v532_v10  ;;  %v1284_v14 = vcombine.low %v513_v8, %v513_v8  ;;  %v582_v11 = vld [vmem:[#allocation2] sm:$0xff] }
 0x34b   : > { %1486 = vpow.bf16 %v812_v9  ;;  %1350 = vmatprep.mubr.msk.bf16.mxu0 %vm451_vm2, %v1283_v12  ;;  %1391 = vmatprep.subr.msk.bf16.mxu0 %vm530_vm3, %v678_v13  ;;  %v583_v12 = vld [vmem:[#allocation2 + $0x8] sm:$0xff]  ;;  %v584_v13 = vld [vmem:[#allocation2 + $0x10] sm:$0xff] }
 0x34c   : > { %v984_v38 = vpop.permute.xlu0 %983 }
 0x34d   : > { %1351 = vmatmul.mubr.msk.bf16.vlgmr.msra.gmra.mrb[4].mxu0 %vm451_vm2, %v1284_v14  ;;  %v992_v40 = vsel %vm530_vm3, %v984_v38, 0 }
 0x34e   : > { %v1485_v16 = vpop.eup %1484  ;;  %1361 = vmatpush3.bf16.msra.mxu0 %v686_v15 }
 0x34f   : > { %v661_v17 = vunpack.c.l.bf16 %v1485_v16  ;;  %v666_v18 = vmul.bf16 %v1485_v16, %v1949_v61  ;;  %v667_v19 = vmul.bf16 %v1485_v16, %v1951_v62  ;;  %v668_v20 = vmul.bf16 %v1485_v16, %v1953_v1 }
 0x351   : > { %v662_v21 = vsel %vm451_vm2, %v661_v17, 0.0  ;;  %v1289_v22 = vcombine.low %v666_v18, %v667_v19  ;;  %v1290_v23 = vcombine.low %v668_v20, %v668_v20 }
 0x352   : > { %663 = vadd.xlane.f32.xlu0 %v662_v21 }
 0x353   : > { %1362 = vmatprep.mubr.msk.bf16.mxu0 %vm451_vm2, %v1289_v22 }
 0x355   : > { %1363 = vmatmul.mubr.msk.bf16.vlgmr.msra.gmra.mrb[8].mxu0 %vm451_vm2, %v1290_v23 }
 0x356   : > { %v1487_v24 = vpop.eup %1486 }
 0x357   : > { %v814_v25 = vunpack.c.l.bf16 %v1487_v24  ;;  %v819_v26 = vmul.bf16 %v1487_v24, %v1949_v61  ;;  %v820_v27 = vmul.bf16 %v1487_v24, %v1951_v62  ;;  %v821_v34 = vmul.bf16 %v1487_v24, %v1953_v1 }
 0x359   : > { %v815_v28 = vsel %vm451_vm2, %v814_v25, 0.0  ;;  %v1295_v29 = vcombine.low %v819_v26, %v820_v27  ;;  %v1296_v39 = vcombine.low %v821_v34, %v821_v34 }
 0x35a   : > { %816 = vadd.xlane.f32.xlu0 %v815_v28 }
 0x35b   : > { %1374 = vmatprep.mubr.msk.bf16.mxu0 %vm451_vm2, %v1295_v29 }
 0x369   : > { %v961_v31 = vpop.xlane.xlu1 %960 }
 0x36a   : > { %v962_v32 = vsub.f32 %v1943_v50, %v961_v31 }
 0x36c   : > { %v963_v33 = vpack.c.bf16 %v962_v32, %v962_v32 }
 0x36d   : > { %v831_v35 = vpop.permute.xlu1 %830 }
 0x36e   : > { %v965_v36 = vmul.bf16 1069105081, %v963_v33  ;;  %v839_v37 = vsel %vm530_vm3, %v831_v35, 0  ;;  %1392 = vmatprep.subr.msk.bf16.mxu0 %vm530_vm3, %v831_v35 }
 0x36f   : > { %1373 = vmatpush3.bf16.msra.mxu0 %v839_v37 }
 0x370   : > { %1488 = vpow.bf16 %v965_v36  ;;  %1393 = vmatprep.subr.msk.bf16.mxu0 %vm530_vm3, %v984_v38 }
 0x372   : > { %1375 = vmatmul.mubr.msk.bf16.vlgmr.msra.gmra.mrb[12].mxu0 %vm451_vm2, %v1296_v39 }
 0x373   : > { %1385 = vmatpush3.bf16.msra.mxu0 %v992_v40  ;;  %v1065_v40 = vlaneseq }
 0x37b   : > { %v1489_v41 = vpop.eup %1488 }
 0x37c   : > { %v967_v42 = vunpack.c.l.bf16 %v1489_v41  ;;  %v972_v43 = vmul.bf16 %v1489_v41, %v1949_v61  ;;  %v973_v44 = vmul.bf16 %v1489_v41, %v1951_v62  ;;  %v974_v45 = vmul.bf16 %v1489_v41, %v1953_v1 }
 0x37e   : > { %v968_v46 = vsel %vm451_vm2, %v967_v42, 0.0  ;;  %v1301_v47 = vcombine.low %v972_v43, %v973_v44  ;;  %v1302_v48 = vcombine.low %v974_v45, %v974_v45 }
 0x37f   : > { %969 = vadd.xlane.f32.xlu1 %v968_v46 }
 0x380   : > { %1386 = vmatprep.mubr.msk.bf16.mxu0 %vm451_vm2, %v1301_v47 }
 0x381   : > { %1387 = vmatmul.mubr.msk.bf16.vlgmr.msra.gmra.mrb[16].mxu0 %vm451_vm2, %v1302_v48 }
 0x3d7   : > { %v509_v49 = vpop.xlane.xlu1 %508 }
 0x3d8   : > { %1490 = vrcp.f32 %v509_v49 }
 0x3df   : > { %v664_v50 = vpop.xlane.xlu0 %663 }
 0x3e0   : > { %1492 = vrcp.f32 %v664_v50 }
 0x3e2   : > { %v1491_v51 = vpop.eup %1490 }
 0x3e3   : > { %587 = vperm.xlu0 %1478, %v1491_v51   ;;  %v1066_v51 = vand.u32 127, %v1065_v40 }
 0x3e5   : > { %vm1068_vm5 = vcmp.eq.s32.totalorder %v1066_v51, 1  ;;  %vm1067_vm6 = vcmp.eq.s32.totalorder %v1066_v51, 0  ;;  %vm1069_vm7 = vcmp.eq.s32.totalorder %v1066_v51, 2 }
 0x3e7   : > { %v817_v52 = vpop.xlane.xlu0 %816 }
 0x3e8   : > { %1494 = vrcp.f32 %v817_v52  ;;  %v1306_v52 = vsel %vm1068_vm5, 1.0, %v1649_v0 }
 0x3ea   : > { %v1493_v53 = vpop.eup %1492 }
 0x3eb   : > { %741 = vperm.xlu1 %1479, %v1493_v53   ;;  %v1305_v53 = vsel %vm1067_vm6, 1.0, %v1649_v0 }
 0x3f2   : > { %v1495_v54 = vpop.eup %1494 }
 0x3f3   : > { %894 = vperm.xlu1 %1479, %v1495_v54  }
 0x40c   : > { %v970_v55 = vpop.xlane.xlu1 %969 }
 0x40d   : > { %1496 = vrcp.f32 %v970_v55 }
 0x417   : > { %v1497_v56 = vpop.eup %1496 }
 0x418   : > { %1047 = vperm.xlu1 %1479, %v1497_v56  }
 0x420   : > { %v1352_v57 = vpop.f32.mrb[4].mxu0 }
 0x421   : > { %v568_v58 = vpop.f32.mrb[5].mxu0 }
 0x422   : > { %v1353_v59 = vpop.f32.mrb[6].mxu0 }
 0x423   : > { %v571_v60 = vpop.f32.mrb[7].mxu0 }
 0x428   : > { %v1364_v61 = vpop.f32.mrb[8].mxu0 }
 0x429   : > { %v722_v62 = vpop.f32.mrb[9].mxu0 }
 0x42a   : > { %v1365_v63 = vpop.f32.mrb[10].mxu0 }
 0x42b   : > { %v725_v1 = vpop.f32.mrb[11].mxu0 }
 0x445   : > { %v1376_v2 = vpop.f32.mrb[12].mxu0 }
 0x446   : > { %v875_v3 = vpop.f32.mrb[13].mxu0 }
 0x447   : > { %v1377_v4 = vpop.f32.mrb[14].mxu0 }
 0x448   : > { %v878_v5 = vpop.f32.mrb[15].mxu0 }
 0x454   : > { %v1388_v6 = vpop.f32.mrb[16].mxu0 }
 0x455   : > { %v1028_v7 = vpop.f32.mrb[17].mxu0 }
 0x456   : > { %v1389_v8 = vpop.f32.mrb[18].mxu0 }
 0x457   : > { %v1031_v9 = vpop.f32.mrb[19].mxu0 }
 0x462   : > { %v588_v10 = vpop.permute.xlu0 %587 }
 0x463   : > { %v590_v14 = vmul.f32 %v588_v10, %v568_v58  ;;  %v591_v15 = vmul.f32 %v588_v10, %v571_v60  ;;  %v592_v16 = vmul.f32 %v1352_v57, %v588_v10  ;;  %v1307_v57 = vsel %vm1069_vm7, 1.0, %v1649_v0 }
 0x465   : > { %v593_v17 = vadd.f32 %v590_v14, %v582_v11  ;;  %v594_v18 = vadd.f32 %v591_v15, %v583_v12  ;;  %v595_v19 = vadd.f32 %v592_v16, %v584_v13 }
 0x467   : > { %597 = vst.msk [vmem:[#allocation2] sm:$0xff] %vm366_vm4, %v593_v17  ;;  %598 = vst.msk [vmem:[#allocation2 + $0x8] sm:$0xff] %vm366_vm4, %v594_v18 }
 0x468   : > { %599 = vst.msk [vmem:[#allocation2 + $0x10] sm:$0xff] %vm366_vm4, %v595_v19 }
 0x46a   : > { %v742_v20 = vpop.permute.xlu1 %741 }
 0x46b   : > { %v744_v21 = vmul.f32 %v742_v20, %v722_v62  ;;  %v745_v22 = vmul.f32 %v742_v20, %v725_v1  ;;  %v746_v23 = vmul.f32 %v1364_v61, %v742_v20  ;;  %v1088_v1 = vld [vmem:[%s2043_s5] sm:$0x7] }
 0x46e   : > { %v736_v24 = vld [vmem:[#allocation2] sm:$0xff]  ;;  %v737_v25 = vld [vmem:[#allocation2 + $0x8] sm:$0xff] }
 0x46f   : > { %v738_v26 = vld [vmem:[#allocation2 + $0x10] sm:$0xff]  ;;  %v747_v27 = vadd.f32 %v744_v21, %v736_v24  ;;  %v748_v28 = vadd.f32 %v745_v22, %v737_v25 }
 0x470   : > { %v749_v29 = vadd.f32 %v746_v23, %v738_v26 }
 0x471   : > { %750 = vst.msk [vmem:[#allocation2] sm:$0xff] %vm366_vm4, %v747_v27  ;;  %751 = vst.msk [vmem:[#allocation2 + $0x8] sm:$0xff] %vm366_vm4, %v748_v28 }
 0x472   : > { %752 = vst.msk [vmem:[#allocation2 + $0x10] sm:$0xff] %vm366_vm4, %v749_v29  ;;  %v895_v30 = vpop.permute.xlu1 %894 }
 0x473   : > { %v897_v31 = vmul.f32 %v895_v30, %v875_v3  ;;  %v898_v32 = vmul.f32 %v895_v30, %v878_v5  ;;  %v899_v33 = vmul.f32 %v1376_v2, %v895_v30  ;;  %v1094_v3 = vshrl.u32 %v1065_v40, 7 }
 0x475   : > { %v1095_v4 = vsub.s32 0, %v1094_v3  ;;  %v1099_v5 = vsub.s32 1, %v1094_v3  ;;  %v1125_v15 = vsub.s32 %v1066_v51, %v1094_v3 }
 0x478   : > { %v889_v34 = vld [vmem:[#allocation2] sm:$0xff]  ;;  %v890_v35 = vld [vmem:[#allocation2 + $0x8] sm:$0xff] }
 0x479   : > { %v891_v36 = vld [vmem:[#allocation2 + $0x10] sm:$0xff]  ;;  %v900_v37 = vadd.f32 %v897_v31, %v889_v34  ;;  %v901_v38 = vadd.f32 %v898_v32, %v890_v35 }
 0x47a   : > { %v902_v39 = vadd.f32 %v899_v33, %v891_v36 }
 0x47b   : > { %903 = vst.msk [vmem:[#allocation2] sm:$0xff] %vm366_vm4, %v900_v37  ;;  %904 = vst.msk [vmem:[#allocation2 + $0x8] sm:$0xff] %vm366_vm4, %v901_v38 }
 0x47c   : > { %905 = vst.msk [vmem:[#allocation2 + $0x10] sm:$0xff] %vm366_vm4, %v902_v39 }
 0x482   : > { %v1042_v45 = vld [vmem:[#allocation2] sm:$0xff]  ;;  %v1043_v46 = vld [vmem:[#allocation2 + $0x8] sm:$0xff] }
 0x483   : > { %v1044_v47 = vld [vmem:[#allocation2 + $0x10] sm:$0xff] }
 0x497   : > { %v1048_v41 = vpop.permute.xlu1 %1047 }
 0x498   : > { %v1050_v42 = vmul.f32 %v1048_v41, %v1028_v7  ;;  %v1051_v43 = vmul.f32 %v1048_v41, %v1031_v9  ;;  %v1052_v44 = vmul.f32 %v1388_v6, %v1048_v41  ;;  %v1103_v6 = vsub.s32 2, %v1094_v3 }
 0x49a   : > { %v1053_v48 = vadd.f32 %v1050_v42, %v1042_v45  ;;  %v1054_v49 = vadd.f32 %v1051_v43, %v1043_v46  ;;  %v1055_v50 = vadd.f32 %v1052_v44, %v1044_v47 }
 0x49c   : > { %1056 = vst.msk [vmem:[#allocation2] sm:$0xff] %vm366_vm4, %v1053_v48  ;;  %1057 = vst.msk [vmem:[#allocation2 + $0x8] sm:$0xff] %vm366_vm4, %v1054_v49 }
 0x49d   : > { %1058 = vst.msk [vmem:[#allocation2 + $0x10] sm:$0xff] %vm366_vm4, %v1055_v50 }
 0x4a3   : > { %v1063_v54 = vld [vmem:[#allocation2 + $0x8] sm:$0xff]  ;;  %v1062_v55 = vld [vmem:[#allocation2] sm:$0xff] }
 0x4a4   : > { %v1064_v56 = vld [vmem:[#allocation2 + $0x10] sm:$0xff]  ;;  %v1077_v58 = vmul.f32 %v1306_v52, %v1063_v54  ;;  %v1076_v59 = vmul.f32 %v1305_v53, %v1062_v55 }
 0x4a5   : > { %v1078_v62 = vmul.f32 %v1307_v57, %v1064_v56 }
 0x4a6   : > { %v1082_v60 = vsel %vm366_vm4, %v1077_v58, 0.0  ;;  %v1079_v61 = vsel %vm366_vm4, %v1076_v59, 0.0 }
 0x4a7   : > { %1083 = vadd.xlane.f32.xlu0 %v1082_v60  ;;  %1080 = vadd.xlane.f32.xlu1 %v1079_v61  ;;  %v1085_v63 = vsel %vm366_vm4, %v1078_v62, 0.0 }
 0x4ab   : > { %1086 = vadd.xlane.f32.xlu1 %v1085_v63 }
 0x4bc   : > { %1091 = vperm.xlu1 %1479, %v1088_v1  }
 0x534   : > { %v1081_v2 = vpop.xlane.xlu1 %1080  ;;  %v1084_v10 = vpop.xlane.xlu0 %1083 }
 0x538   : > { %v1087_v0 = vpop.xlane.xlu1 %1086 }
 0x53c   : > { %v1092_v7 = vpop.permute.xlu1 %1091 }
 0x53d   : > { %v1096_v8 = vrot.slane %v1092_v7, %v1095_v4  ;;  %v1100_v9 = vrot.slane %v1092_v7, %v1099_v5  ;;  %v1104_v11 = vrot.slane %v1092_v7, %v1103_v6 }
 0x53f   : > { %v1109_v12 = vadd.f32 %v1100_v9, %v1084_v10  ;;  %v1108_v13 = vadd.f32 %v1096_v8, %v1081_v2  ;;  %v1110_v14 = vadd.f32 %v1104_v11, %v1087_v0 }
 0x541   : > { %1118 = vperm.xlu1 %1479, %v1109_v12   ;;  %1115 = vperm.xlu0 %1478, %v1108_v13  }
 0x545   : > { %1121 = vperm.xlu1 %1479, %v1110_v14  }
 0x5c0   : > { %v1119_v16 = vpop.permute.xlu1 %1118  ;;  %v1116_v17 = vpop.permute.xlu0 %1115 }
 0x5c1   : > { %v1130_v18 = vrot.slane %v1119_v16, %v1125_v15  ;;  %v1126_v19 = vrot.slane %v1116_v17, %v1125_v15 }
 0x5c3   : > { %v1136_v22 = vsel %vm1135_vm8, %v1130_v18, %v1126_v19 }
 0x5c4   : > { %v1122_v20 = vpop.permute.xlu1 %1121 }
 0x5c5   : > { %v1134_v21 = vrot.slane %v1122_v20, %v1125_v15 }
 0x5c7   : > { %v1138_v23 = vsel %vm1137_vm9, %v1134_v21, %v1136_v22 }
 0x5c8   : > { %1141 = vst.msk [vmem:[%s360_s15] sm:$0x7] %vm1140_vm10, %v1138_v23 }
 0x5c9 PF: > { %s22_s26 = sadd.s32 1, %s1642_s26   ;;  %s2061_s21 = smov %s1626_s22 }
 0x5ca   : > { %p19_p2 = scmp.ge.s32.totalorder %s22_s26, 4   ;;  %s2062_s22 = smov %s1630_s23 }
 0x5cb   : > { %s2063_s23 = smov %s1745_s8  ;;  %s2064_s24 = smov %s1638_s25 }
 0x5cc   : > { %s2065_s25 = smov %s2067_s28  ;;  %21 = sbr.rel (!%p19_p2) target bundleno = 8 (0x8), region = 121 }
 0x5d3   :  { %1161 = vsyncpa [#allocation4], 1 }
 0x5d4   :  { %1163 = vsyncpa [#allocation4 + $0x1], 1 }
 0x5d5   :  { %1164 = vsyncpa [#allocation6], 1 }
 0x5d6   :  { %1166 = vsyncpa [#allocation6 + $0x1], 1 }

</bundles_post_ra>
